<compile_context>
chip_gen: v7x
topology: tpu7x:2x2x1
jax: 0.10.0
libtpu: 0.0.40
codegen_flags: <defaults>
</compile_context>

<pallas_src>
import functools

import jax
import jax.numpy as jnp
from jax.experimental import pallas as pl
from jax.experimental.pallas import tpu as pltpu

LANE = 128


def _round_up(x, m):
    return (x + m - 1) // m * m


def _leaky_relu(x, slope=0.01):
    return jnp.where(x > 0, x, slope * x)


def holographic_kernel(
    x_ref,                       # (TB, input_dim)  f32 (cast to bf16 in-kernel)
    w_e1_ref, b_e1_ref,          # (input_dim, hp) bf16 / (1, hp) f32
    w_e2_ref, b_e2_ref,          # (hp, bp) bf16 / (1, bp) f32
    w_d1_ref, b_d1_ref,          # (bp, hp) bf16 / (1, hp) f32
    w_f_ref,  b_f_ref,           # fused [w_d2 ; w_lat]: (hp+bp, out_p) bf16 / (1, out_p) f32
    out_ref,                     # (TB, out_p) bf16 packed [recon | latent | 0]
    *, input_dim, act_dtype,
):
    bf16 = jnp.bfloat16
    x = x_ref[...].astype(bf16)

    # ---- encoder layer 1: Linear + LeakyReLU (K = input_dim, un-padded) ----
    h = jnp.dot(x, w_e1_ref[...], preferred_element_type=jnp.float32) + b_e1_ref[...]
    h = _leaky_relu(h.astype(act_dtype))

    # ---- encoder layer 2: Linear + Tanh ----
    boundary = jnp.tanh(
        (jnp.dot(h.astype(bf16), w_e2_ref[...], preferred_element_type=jnp.float32)
         + b_e2_ref[...]).astype(act_dtype)
    )
    bb = boundary.astype(bf16)

    # ---- decoder layer 1: Linear + LeakyReLU ----
    d = _leaky_relu(
        (jnp.dot(bb, w_d1_ref[...], preferred_element_type=jnp.float32)
         + b_d1_ref[...]).astype(act_dtype)
    )

    # ---- fused final matmul: [d | boundary] @ [[w_d2, 0], [0, w_lat]] ----
    # cols [0, input_dim)                     -> decoder layer 2 logits
    # cols [input_dim, input_dim+latent_dim)  -> latent projection
    cat = jnp.concatenate([d.astype(bf16), bb], axis=-1)   # 128-aligned concat
    final = (jnp.dot(cat, w_f_ref[...], preferred_element_type=jnp.float32)
             + b_f_ref[...]).astype(act_dtype)

    col = jax.lax.broadcasted_iota(jnp.int32, final.shape, 1)
    out = jnp.where(col < input_dim, jax.nn.sigmoid(final), final)
    out_ref[...] = out.astype(out_ref.dtype)


def _pad2(a, rows, cols):
    r, c = a.shape
    return jnp.pad(a, ((0, rows - r), (0, cols - c)))


def pack_params(params):
    """Pad hidden/boundary dims to 128 lanes, cast weights to bf16, and build
    the fused block-diagonal [w_d2 | w_lat] final weight."""
    input_dim, hidden = params["w_e1"].shape
    boundary_dim = params["w_e2"].shape[1]
    latent_dim = params["w_lat"].shape[1]

    hp = _round_up(hidden, LANE)
    bp = _round_up(boundary_dim, LANE)
    out_p = _round_up(input_dim + latent_dim, LANE)

    bf16 = jnp.bfloat16

    w_f = jnp.zeros((hp + bp, out_p), jnp.float32)
    w_f = w_f.at[:hidden, :input_dim].set(params["w_d2"])
    w_f = w_f.at[hp:hp + boundary_dim,
                 input_dim:input_dim + latent_dim].set(params["w_lat"])
    b_f = jnp.zeros((1, out_p), jnp.float32)
    b_f = b_f.at[:, :input_dim].set(params["b_d2"][0])
    b_f = b_f.at[:, input_dim:input_dim + latent_dim].set(params["b_lat"][0])

    packed = dict(
        w_e1=_pad2(params["w_e1"], input_dim, hp).astype(bf16),
        b_e1=_pad2(params["b_e1"], 1, hp),
        w_e2=_pad2(params["w_e2"], hp, bp).astype(bf16),
        b_e2=_pad2(params["b_e2"], 1, bp),
        w_d1=_pad2(params["w_d1"], bp, hp).astype(bf16),
        b_d1=_pad2(params["b_d1"], 1, hp),
        w_f=w_f.astype(bf16),
        b_f=b_f,
    )
    packed["dims"] = (input_dim, hidden, boundary_dim, latent_dim)
    packed["padded"] = (hp, bp, out_p)
    return packed


def _choose_batch_tile(B, block_batch):
    # Sublane-aligned tile; if the whole batch fits in one step, split in two
    # so both v7x TensorCores get a grid step (negligible cost on v5e/v6e).
    target = min(block_batch, B)
    if target >= B and B > 8:
        target = (B + 1) // 2
    TB = _round_up(max(target, 1), 8)
    return min(TB, _round_up(B, 8))


def holographic_encoder_forward(x, packed, *, block_batch=1024,
                                act_dtype=jnp.float32, return_packed=False):
    """Returns (reconstruction, latent) of the HolographicEncoder forward pass.

    If `return_packed=True`, returns the raw (B, out_p) bf16 slab
    [recon | latent | pad] so downstream consumers can avoid the depad slices.
    """
    input_dim, _, _, latent_dim = packed["dims"]
    _, _, out_p = packed["padded"]

    B = x.shape[0]
    TB = _choose_batch_tile(B, block_batch)
    Bp = _round_up(B, TB)
    xp = x if Bp == B else jnp.pad(x, ((0, Bp - B), (0, 0)))  # batch-only pad

    weight_args = (
        packed["w_e1"], packed["b_e1"],
        packed["w_e2"], packed["b_e2"],
        packed["w_d1"], packed["b_d1"],
        packed["w_f"], packed["b_f"],
    )

    def tile_map(i):          # activation blocks follow the batch grid
        return (i, 0)

    def resident_map(i):      # weights/biases: same block every step -> stay in VMEM
        return (0, 0)

    in_specs = [pl.BlockSpec((TB, input_dim), tile_map)]
    in_specs += [pl.BlockSpec(w.shape, resident_map) for w in weight_args]

    out = pl.pallas_call(
        functools.partial(holographic_kernel, input_dim=input_dim,
                          act_dtype=act_dtype),
        grid=(Bp // TB,),
        in_specs=in_specs,
        out_specs=pl.BlockSpec((TB, out_p), tile_map),
        out_shape=jax.ShapeDtypeStruct((Bp, out_p), jnp.bfloat16),
        compiler_params=pltpu.CompilerParams(
            dimension_semantics=("parallel",),
        ),
    )(xp, *weight_args)

    if return_packed:
        return out[:B]
    slab = out[:B]
    return slab[:, :input_dim], slab[:, input_dim:input_dim + latent_dim]


def init_params(key, input_dim, boundary_dim, latent_dim):
    """PyTorch-like (uniform +-1/sqrt(fan_in)) init; weights stored [in, out]."""
    hidden = input_dim // 2

    def linear(k, fan_in, fan_out):
        kw, kb = jax.random.split(k)
        bound = 1.0 / jnp.sqrt(fan_in)
        w = jax.random.uniform(kw, (fan_in, fan_out), jnp.float32, -bound, bound)
        b = jax.random.uniform(kb, (1, fan_out), jnp.float32, -bound, bound)
        return w, b

    keys = jax.random.split(key, 5)
    w_e1, b_e1 = linear(keys[0], input_dim, hidden)
    w_e2, b_e2 = linear(keys[1], hidden, boundary_dim)
    w_lat, b_lat = linear(keys[2], boundary_dim, latent_dim)
    w_d1, b_d1 = linear(keys[3], boundary_dim, hidden)
    w_d2, b_d2 = linear(keys[4], hidden, input_dim)
    return dict(
        w_e1=w_e1, b_e1=b_e1,
        w_e2=w_e2, b_e2=b_e2,
        w_lat=w_lat, b_lat=b_lat,
        w_d1=w_d1, b_d1=b_d1,
        w_d2=w_d2, b_d2=b_d2,
    )


def reference_forward(x, p):
    """Pure-JAX f32 reference for verification."""
    def lrelu(v):
        return jnp.where(v > 0, v, 0.01 * v)

    h = lrelu(x @ p["w_e1"] + p["b_e1"])
    boundary = jnp.tanh(h @ p["w_e2"] + p["b_e2"])
    latent = boundary @ p["w_lat"] + p["b_lat"]
    d = lrelu(boundary @ p["w_d1"] + p["b_d1"])
    recon = jax.nn.sigmoid(d @ p["w_d2"] + p["b_d2"])
    return recon, latent


if __name__ == "__main__":
    key = jax.random.PRNGKey(0)
    k_param, k_x = jax.random.split(key)

    batch = 256            # exercises a 2-step batch-tiled grid
    input_dim = 64
    boundary_dim = 32
    latent_dim = 16

    params = init_params(k_param, input_dim, boundary_dim, latent_dim)
    packed = pack_params(params)
    x = jax.random.normal(k_x, (batch, input_dim), jnp.float32)

    recon, latent = holographic_encoder_forward(x, packed)
    recon = jax.block_until_ready(recon)
    latent = jax.block_until_ready(latent)

    recon_ref, latent_ref = reference_forward(x, params)
    assert recon.shape == (batch, input_dim)
    assert latent.shape == (batch, latent_dim)
    # bf16 MXU operands + bf16 output stores (f32 accumulation) -> relaxed tol.
    assert jnp.allclose(recon.astype(jnp.float32), recon_ref, atol=2e-2, rtol=2e-2), \
        float(jnp.max(jnp.abs(recon.astype(jnp.float32) - recon_ref)))
    assert jnp.allclose(latent.astype(jnp.float32), latent_ref, atol=2e-2, rtol=2e-2), \
        float(jnp.max(jnp.abs(latent.astype(jnp.float32) - latent_ref)))

    print("KERNEL_OK")
</pallas_src>

<mosaic_0001>
module attributes {stable_mosaic.version = 11 : i64} {
  func.func @holographic_kernel(%arg0: i32, %arg1: memref<128x64xf32, #tpu.memory_space<vmem>>, %arg2: memref<64x128xbf16, #tpu.memory_space<vmem>>, %arg3: memref<1x128xf32, #tpu.memory_space<vmem>>, %arg4: memref<128x128xbf16, #tpu.memory_space<vmem>>, %arg5: memref<1x128xf32, #tpu.memory_space<vmem>>, %arg6: memref<128x128xbf16, #tpu.memory_space<vmem>>, %arg7: memref<1x128xf32, #tpu.memory_space<vmem>>, %arg8: memref<256x128xbf16, #tpu.memory_space<vmem>>, %arg9: memref<1x128xf32, #tpu.memory_space<vmem>>, %arg10: memref<128x128xbf16, #tpu.memory_space<vmem>>) attributes {dimension_semantics = [#tpu.dimension_semantics<parallel>], iteration_bounds = array<i64: 2>, scalar_prefetch = 0 : i64, scratch_operands = 0 : i64, tpu.core_type = #tpu.core_type<tc>, window_params = [{transform_indices = @transform_0, window_bounds = array<i64: 128, 64>}, {pipeline_mode = #tpu.pipeline_mode<synchronous>, transform_indices = @transform_1, window_bounds = array<i64: 64, 128>}, {pipeline_mode = #tpu.pipeline_mode<synchronous>, transform_indices = @transform_2, window_bounds = array<i64: 1, 128>}, {pipeline_mode = #tpu.pipeline_mode<synchronous>, transform_indices = @transform_3, window_bounds = array<i64: 128, 128>}, {pipeline_mode = #tpu.pipeline_mode<synchronous>, transform_indices = @transform_4, window_bounds = array<i64: 1, 128>}, {pipeline_mode = #tpu.pipeline_mode<synchronous>, transform_indices = @transform_5, window_bounds = array<i64: 128, 128>}, {pipeline_mode = #tpu.pipeline_mode<synchronous>, transform_indices = @transform_6, window_bounds = array<i64: 1, 128>}, {pipeline_mode = #tpu.pipeline_mode<synchronous>, transform_indices = @transform_7, window_bounds = array<i64: 256, 128>}, {pipeline_mode = #tpu.pipeline_mode<synchronous>, transform_indices = @transform_8, window_bounds = array<i64: 1, 128>}, {transform_indices = @transform_9, window_bounds = array<i64: 128, 128>}]} {
    %c0 = arith.constant 0 : index
    %c0_0 = arith.constant 0 : index
    %0 = vector.load %arg1[%c0, %c0_0] : memref<128x64xf32, #tpu.memory_space<vmem>>, vector<128x64xf32>
    %1 = arith.truncf %0 : vector<128x64xf32> to vector<128x64xbf16>
    %c0_1 = arith.constant 0 : index
    %c0_2 = arith.constant 0 : index
    %2 = vector.load %arg2[%c0_1, %c0_2] : memref<64x128xbf16, #tpu.memory_space<vmem>>, vector<64x128xbf16>
    %cst = arith.constant dense<0.000000e+00> : vector<128x128xf32>
    %3 = tpu.matmul %1, %2, %cst {dimension_numbers = #tpu.dot_dimension_numbers<[1], [0], [0], [1], [0, 0, 1, 1], [], []>} : vector<128x64xbf16>, vector<64x128xbf16>, vector<128x128xf32> -> vector<128x128xf32>
    %c0_3 = arith.constant 0 : index
    %c0_4 = arith.constant 0 : index
    %4 = vector.load %arg3[%c0_3, %c0_4] : memref<1x128xf32, #tpu.memory_space<vmem>>, vector<1x128xf32>
    %5 = vector.broadcast %4 : vector<1x128xf32> to vector<128x128xf32>
    %6 = arith.addf %3, %5 : vector<128x128xf32>
    %cst_5 = arith.constant 0.000000e+00 : f32
    %7 = vector.broadcast %cst_5 : f32 to vector<128x128xf32>
    %8 = arith.cmpf ogt, %6, %7 : vector<128x128xf32>
    %cst_6 = arith.constant 0.00999999977 : f32
    %9 = vector.broadcast %cst_6 : f32 to vector<128x128xf32>
    %10 = arith.mulf %9, %6 : vector<128x128xf32>
    %11 = arith.select %8, %6, %10 : vector<128x128xi1>, vector<128x128xf32>
    %12 = arith.truncf %11 : vector<128x128xf32> to vector<128x128xbf16>
    %c0_7 = arith.constant 0 : index
    %c0_8 = arith.constant 0 : index
    %13 = vector.load %arg4[%c0_7, %c0_8] : memref<128x128xbf16, #tpu.memory_space<vmem>>, vector<128x128xbf16>
    %cst_9 = arith.constant dense<0.000000e+00> : vector<128x128xf32>
    %14 = tpu.matmul %12, %13, %cst_9 {dimension_numbers = #tpu.dot_dimension_numbers<[1], [0], [0], [1], [0, 0, 1, 1], [], []>} : vector<128x128xbf16>, vector<128x128xbf16>, vector<128x128xf32> -> vector<128x128xf32>
    %c0_10 = arith.constant 0 : index
    %c0_11 = arith.constant 0 : index
    %15 = vector.load %arg5[%c0_10, %c0_11] : memref<1x128xf32, #tpu.memory_space<vmem>>, vector<1x128xf32>
    %16 = vector.broadcast %15 : vector<1x128xf32> to vector<128x128xf32>
    %17 = arith.addf %14, %16 : vector<128x128xf32>
    %18 = math.tanh %17 : vector<128x128xf32>
    %19 = arith.truncf %18 : vector<128x128xf32> to vector<128x128xbf16>
    %c0_12 = arith.constant 0 : index
    %c0_13 = arith.constant 0 : index
    %20 = vector.load %arg6[%c0_12, %c0_13] : memref<128x128xbf16, #tpu.memory_space<vmem>>, vector<128x128xbf16>
    %cst_14 = arith.constant dense<0.000000e+00> : vector<128x128xf32>
    %21 = tpu.matmul %19, %20, %cst_14 {dimension_numbers = #tpu.dot_dimension_numbers<[1], [0], [0], [1], [0, 0, 1, 1], [], []>} : vector<128x128xbf16>, vector<128x128xbf16>, vector<128x128xf32> -> vector<128x128xf32>
    %c0_15 = arith.constant 0 : index
    %c0_16 = arith.constant 0 : index
    %22 = vector.load %arg7[%c0_15, %c0_16] : memref<1x128xf32, #tpu.memory_space<vmem>>, vector<1x128xf32>
    %23 = vector.broadcast %22 : vector<1x128xf32> to vector<128x128xf32>
    %24 = arith.addf %21, %23 : vector<128x128xf32>
    %cst_17 = arith.constant 0.000000e+00 : f32
    %25 = vector.broadcast %cst_17 : f32 to vector<128x128xf32>
    %26 = arith.cmpf ogt, %24, %25 : vector<128x128xf32>
    %cst_18 = arith.constant 0.00999999977 : f32
    %27 = vector.broadcast %cst_18 : f32 to vector<128x128xf32>
    %28 = arith.mulf %27, %24 : vector<128x128xf32>
    %29 = arith.select %26, %24, %28 : vector<128x128xi1>, vector<128x128xf32>
    %30 = arith.truncf %29 : vector<128x128xf32> to vector<128x128xbf16>
    %31 = tpu.concatenate %30, %19 in 1 : vector<128x128xbf16>, vector<128x128xbf16> -> vector<128x256xbf16>
    %c0_19 = arith.constant 0 : index
    %c0_20 = arith.constant 0 : index
    %32 = vector.load %arg8[%c0_19, %c0_20] : memref<256x128xbf16, #tpu.memory_space<vmem>>, vector<256x128xbf16>
    %cst_21 = arith.constant dense<0.000000e+00> : vector<128x128xf32>
    %33 = tpu.matmul %31, %32, %cst_21 {dimension_numbers = #tpu.dot_dimension_numbers<[1], [0], [0], [1], [0, 0, 1, 1], [], []>} : vector<128x256xbf16>, vector<256x128xbf16>, vector<128x128xf32> -> vector<128x128xf32>
    %c0_22 = arith.constant 0 : index
    %c0_23 = arith.constant 0 : index
    %34 = vector.load %arg9[%c0_22, %c0_23] : memref<1x128xf32, #tpu.memory_space<vmem>>, vector<1x128xf32>
    %35 = vector.broadcast %34 : vector<1x128xf32> to vector<128x128xf32>
    %36 = arith.addf %33, %35 : vector<128x128xf32>
    %37 = tpu.iota {dimensions = array<i32: 1>} : vector<128x128xi32>
    %c64_i32 = arith.constant 64 : i32
    %38 = vector.broadcast %c64_i32 : i32 to vector<128x128xi32>
    %39 = arith.cmpi slt, %37, %38 : vector<128x128xi32>
    %40 = arith.negf %36 : vector<128x128xf32>
    %41 = math.exp %40 : vector<128x128xf32>
    %cst_24 = arith.constant 1.000000e+00 : f32
    %42 = vector.broadcast %cst_24 : f32 to vector<128x128xf32>
    %43 = arith.addf %42, %41 : vector<128x128xf32>
    %44 = arith.divf %42, %43 : vector<128x128xf32>
    %45 = arith.select %39, %44, %36 : vector<128x128xi1>, vector<128x128xf32>
    %46 = arith.truncf %45 : vector<128x128xf32> to vector<128x128xbf16>
    %c0_25 = arith.constant 0 : index
    %c0_26 = arith.constant 0 : index
    %47 = vector.load %arg10[%c0_25, %c0_26] : memref<128x128xbf16, #tpu.memory_space<vmem>>, vector<128x128xbf16>
    tpu.vector_store %arg10[%c0_25, %c0_26], %46 {strides = array<i32>} : memref<128x128xbf16, #tpu.memory_space<vmem>>, vector<128x128xbf16>,
    return
  }
  func.func @transform_0(%arg0: i32) -> (i32, i32) {
    %c0_i32 = arith.constant 0 : i32
    %c0_i32_0 = arith.constant 0 : i32
    return %arg0, %c0_i32 : i32, i32
  }
  func.func @transform_1(%arg0: i32) -> (i32, i32) {
    %c0_i32 = arith.constant 0 : i32
    %c0_i32_0 = arith.constant 0 : i32
    %c0_i32_1 = arith.constant 0 : i32
    return %c0_i32, %c0_i32_0 : i32, i32
  }
  func.func @transform_2(%arg0: i32) -> (i32, i32) {
    %c0_i32 = arith.constant 0 : i32
    %c0_i32_0 = arith.constant 0 : i32
    %c0_i32_1 = arith.constant 0 : i32
    return %c0_i32, %c0_i32_0 : i32, i32
  }
  func.func @transform_3(%arg0: i32) -> (i32, i32) {
    %c0_i32 = arith.constant 0 : i32
    %c0_i32_0 = arith.constant 0 : i32
    %c0_i32_1 = arith.constant 0 : i32
    return %c0_i32, %c0_i32_0 : i32, i32
  }
  func.func @transform_4(%arg0: i32) -> (i32, i32) {
    %c0_i32 = arith.constant 0 : i32
    %c0_i32_0 = arith.constant 0 : i32
    %c0_i32_1 = arith.constant 0 : i32
    return %c0_i32, %c0_i32_0 : i32, i32
  }
  func.func @transform_5(%arg0: i32) -> (i32, i32) {
    %c0_i32 = arith.constant 0 : i32
    %c0_i32_0 = arith.constant 0 : i32
    %c0_i32_1 = arith.constant 0 : i32
    return %c0_i32, %c0_i32_0 : i32, i32
  }
  func.func @transform_6(%arg0: i32) -> (i32, i32) {
    %c0_i32 = arith.constant 0 : i32
    %c0_i32_0 = arith.constant 0 : i32
    %c0_i32_1 = arith.constant 0 : i32
    return %c0_i32, %c0_i32_0 : i32, i32
  }
  func.func @transform_7(%arg0: i32) -> (i32, i32) {
    %c0_i32 = arith.constant 0 : i32
    %c0_i32_0 = arith.constant 0 : i32
    %c0_i32_1 = arith.constant 0 : i32
    return %c0_i32, %c0_i32_0 : i32, i32
  }
  func.func @transform_8(%arg0: i32) -> (i32, i32) {
    %c0_i32 = arith.constant 0 : i32
    %c0_i32_0 = arith.constant 0 : i32
    %c0_i32_1 = arith.constant 0 : i32
    return %c0_i32, %c0_i32_0 : i32, i32
  }
  func.func @transform_9(%arg0: i32) -> (i32, i32) {
    %c0_i32 = arith.constant 0 : i32
    %c0_i32_0 = arith.constant 0 : i32
    return %arg0, %c0_i32 : i32, i32
  }
}

</mosaic_0001>

<bundles_post_ra>
// kernel: tpu_custom_call.1
= control target key start
LH: loop header
LB: loop body
LE: loop exit
PB: predicated region body
PF: predicated region fallthrough
CT: control target
= control target key end

     0   :  { %14 = vsyncpa [#allocation3], 0  ;;  %s2643_s0 = inlined_call_operand.vmem [shape: f32[256,64], index: 0, kind: input, shape index: {}]   ;;  %s2644_s1 = inlined_call_operand.vmem [shape: bf16[64,128], index: 1, kind: input, shape index: {}]   ;;  %s2645_s2 = inlined_call_operand.vmem [shape: f32[1,128], index: 2, kind: input, shape index: {}]   ;;  %s2646_s3 = inlined_call_operand.vmem [shape: bf16[128,128], index: 3, kind: input, shape index: {}]   ;;  %s2647_s4 = inlined_call_operand.vmem [shape: f32[1,128], index: 4, kind: input, shape index: {}]   ;;  %s2648_s5 = inlined_call_operand.vmem [shape: bf16[128,128], index: 5, kind: input, shape index: {}]   ;;  %s2649_s6 = inlined_call_operand.vmem [shape: f32[1,128], index: 6, kind: input, shape index: {}]   ;;  %s2650_s7 = inlined_call_operand.vmem [shape: bf16[256,128], index: 7, kind: input, shape index: {}]   ;;  %s2651_s8 = inlined_call_operand.vmem [shape: f32[1,128], index: 8, kind: input, shape index: {}]   ;;  %s2652_s9 = inlined_call_operand.hbm [shape: bf16[256,128], index: 9, kind: output, shape index: {}]  }
   0x1   :  { %16 = vsyncpa [#allocation3 + $0x1], 0  ;;  %s2153_s30 = smov 0   ;;  %s2155_s10 = smov 0  }
   0x2   :  { %s2157_s11 = smov 0   ;;  %s2159_s12 = smov 0  }
   0x3 LB: > { %s2174_s13 = sadd.s32 4294967295, %s2098_s12   ;;  %s1495_s14 = sadd.s32 4294967294, %s2098_s12   ;;  %s2098_s12 = sphi %s2159_s12, %s2658_s12   ;;  %s2094_s11 = sphi %s2157_s11, %s2657_s11   ;;  %s2090_s10 = sphi %s2155_s10, %s2656_s10   ;;  %s2086_s30 = sphi %s2153_s30, %s2655_s30  }
   0x4   : > { %s2178_s15 = sadd.s32 1, %s2098_s12   ;;  %s223_s16 = sadd.s32 1, %s2094_s11 }
   0x5   : > { %s220_s17 = ssub.s32 %s2098_s12, %s2178_s15  ;;  %p233_p0 = scmp.ne.s32.totalorder %s2094_s11, %s2090_s10 }
   0x6   : > { %p221_p1 = scmp.eq.s32.totalorder %s220_s17, 0  ;;  %p234_p2 = scmp.eq.s32.totalorder %s2174_s13, 1 }
   0x7   : > { %p239_p3 = scmp.ne.s32.totalorder %s2090_s10, %s2086_s30  ;;  %p240_p4 = scmp.eq.s32.totalorder %s1495_s14, 1 }
   0x8   : > { %s2189_s18 = scalar_select %p221_p1, %s2094_s11, %s223_s16  }
   0x9   : > { %p2191_p5 = por %p234_p2, %p233_p0  ;;  %p2195_p6 = por %p240_p4, %p239_p3 }
   0xa   : > { %p1498_p7 = scmp.ge.s32.totalorder %s2098_s12, 1  ;;  %p291_p8 = scmp.lt.s32.totalorder %s2098_s12, 3 }
   0xc   : > { %p292_p9 = pnand %p1498_p7, %p291_p8 }
   0xd   : > { %v1904_v0 = vld [vmem:[%s2644_s1] sm:$0xff] (!%p292_p9)   ;;  %s1500_s23 = sshll.u32 (!%p292_p9), %s2174_s13, 4  ;;  %v1905_v1 = vld [vmem:[%s2644_s1 + $0x8] sm:$0xff] (!%p292_p9)   ;;  %v1906_v2 = vld [vmem:[%s2644_s1 + $0x10] sm:$0xff] (!%p292_p9)   ;;  %vm398_vm0 = vcmask (!%p292_p9), 523264   ;;  %s324_s22 = sand.u32 (!%p292_p9), 1, %s2090_s10  }
   0xe   : > { %295 = sbr.rel (%p292_p9) target bundleno = 1009 (0x3f1), region = 56  ;;  %p328_p10 = scmp.lt.s32.totalorder (!%p292_p9), %s1500_s23, 31  ;;  %1759 = vmatprep.subr.bf16.mxu0 (!%p292_p9), %v1904_v0  ;;  %v1908_v3 = vld [vmem:[%s2646_s3] sm:$0xff] (!%p292_p9)   ;;  %v1909_v4 = vld [vmem:[%s2646_s3 + $0x8] sm:$0xff] (!%p292_p9)   ;;  %v1907_v7 = vld [vmem:[%s2644_s1 + $0x18] sm:$0xff] (!%p292_p9)  }
   0xf   : > { %1760 = vmatpush3.bf16.msra.mxu0 (!%p292_p9), %v1904_v0  ;;  %1783 = vmatprep.subr.bf16.mxu1 (!%p292_p9), %v1908_v3  ;;  %v1910_v9 = vld [vmem:[%s2646_s3 + $0x10] sm:$0xff] (!%p292_p9)   ;;  %v1911_v14 = vld [vmem:[%s2646_s3 + $0x18] sm:$0xff] (!%p292_p9)   ;;  %v1912_v16 = vld [vmem:[%s2646_s3 + $0x20] sm:$0xff] (!%p292_p9)   ;;  %s1603_s26 = sshll.u32 (!%p292_p9), %s2174_s13, 10  ;;  %s2602_s13 = scalar_lea.sflag (!%p292_p9), [#allocation3], %s324_s22 }
  0x10   : > { %1761 = vmatprep.subr.bf16.mxu0 (!%p292_p9), %v1905_v1  ;;  %1784 = vmatpush3.bf16.msra.mxu1 (!%p292_p9), %v1908_v3  ;;  %v1913_v33 = vld [vmem:[%s2646_s3 + $0x28] sm:$0xff] (!%p292_p9)   ;;  %v1914_v34 = vld [vmem:[%s2646_s3 + $0x30] sm:$0xff] (!%p292_p9)   ;;  %v1915_v35 = vld [vmem:[%s2646_s3 + $0x38] sm:$0xff] (!%p292_p9)   ;;  %s2595_s29 = scalar_lea.hbm (!%p292_p9), %s2652_s9, %s1603_s26  ;;  %s2100_s16 = smov (!%p292_p9), [#allocation2]  }
  0x11   : > { %1785 = vmatprep.subr.bf16.mxu1 (!%p292_p9), %v1909_v4  ;;  %v1916_v36 = vld [vmem:[%s2648_s5] sm:$0xff] (!%p292_p9)   ;;  %v1917_v37 = vld [vmem:[%s2648_s5 + $0x8] sm:$0xff] (!%p292_p9)   ;;  %v1918_v38 = vld [vmem:[%s2648_s5 + $0x10] sm:$0xff] (!%p292_p9)   ;;  %s2040_s17 = sshll.u32 (!%p292_p9), %s2100_s16, 4  ;;  %s2041_s17 = int_to_ptr.vmem [resolvable:$false] %s2040_s17 }
  0x12   : > { %v1919_v39 = vld [vmem:[%s2648_s5 + $0x18] sm:$0xff] (!%p292_p9)   ;;  %v2282_v40 = vld [vmem:[%s2645_s2] ss:$0 sm:$0xff] (!%p292_p9)  ;;  %s2042_s21 = scalar_lea.vmem (!%p292_p9), %s2041_s17, 2048 }
  0x13   : > { %1762 = vmatpush3.bf16.msra.mxu0 (!%p292_p9), %v1905_v1 }
  0x14   : > { %1763 = vmatprep.subr.bf16.mxu0 (!%p292_p9), %v1906_v2  ;;  %1786 = vmatpush3.bf16.msra.mxu1 (!%p292_p9), %v1909_v4 }
  0x15   : > { %s2660_s23 = smov (!%p328_p10, %s1500_s23), 31  ;;  %1787 = vmatprep.subr.bf16.mxu1 %v1910_v9 }
  0x16   : > { %s1501_s14 = sshll.u32 %s2660_s23, 3  ;;  %s1499_s23 = sshll.u32 %s324_s22, 6 }
  0x17   : > { %s2220_s24 = scalar_lea.vmem %s2643_s0, %s1501_s14  ;;  %1764 = vmatpush3.bf16.msra.mxu0 %v1906_v2  ;;  %s2534_s25 = scalar_lea.vmem [#allocation2], %s1499_s23 }
  0x18   : > { %v335_v5 = vld [vmem:[%s2220_s24] sm:$0xff]  ;;  %v336_v6 = vld [vmem:[%s2220_s24 + $0x8] sm:$0xff]  ;;  %v337_v10 = vld [vmem:[%s2220_s24 + $0x10] sm:$0xff]  ;;  %1765 = vmatprep.subr.bf16.mxu0 %v1907_v7  ;;  %1788 = vmatpush3.bf16.msra.mxu1 %v1910_v9 }
  0x19   : > { %v351_v8 = vpack.c.bf16 %v336_v6, %v335_v5  ;;  %v338_v11 = vld [vmem:[%s2220_s24 + $0x18] sm:$0xff]  ;;  %v339_v12 = vld [vmem:[%s2220_s24 + $0x20] sm:$0xff]  ;;  %v340_v13 = vld [vmem:[%s2220_s24 + $0x28] sm:$0xff]  ;;  %1789 = vmatprep.subr.bf16.mxu1 %v1911_v14 }
  0x1a   : > { %v352_v15 = vpack.c.bf16 %v338_v11, %v337_v10  ;;  %v353_v17 = vpack.c.bf16 %v340_v13, %v339_v12  ;;  %v341_v18 = vld [vmem:[%s2220_s24 + $0x30] sm:$0xff]  ;;  %v342_v19 = vld [vmem:[%s2220_s24 + $0x38] sm:$0xff]  ;;  %v343_v20 = vld [vmem:[%s2220_s24 + $0x40] sm:$0xff] }
  0x1b   : > { %1767 = vmatprep.mubr.msk.bf16.mxu0 %vm398_vm0, %v351_v8  ;;  %1766 = vmatpush3.bf16.msra.mxu0 %v1907_v7  ;;  %v344_v21 = vld [vmem:[%s2220_s24 + $0x48] sm:$0xff]  ;;  %v354_v22 = vpack.c.bf16 %v342_v19, %v341_v18  ;;  %v345_v24 = vld [vmem:[%s2220_s24 + $0x50] sm:$0xff]  ;;  %v346_v25 = vld [vmem:[%s2220_s24 + $0x58] sm:$0xff] }
  0x1c   : > { %1790 = vmatpush3.bf16.msra.mxu1 %v1911_v14  ;;  %v355_v23 = vpack.c.bf16 %v344_v21, %v343_v20  ;;  %v347_v26 = vld [vmem:[%s2220_s24 + $0x60] sm:$0xff]  ;;  %v348_v27 = vld [vmem:[%s2220_s24 + $0x68] sm:$0xff]  ;;  %v356_v28 = vpack.c.bf16 %v346_v25, %v345_v24  ;;  %v349_v30 = vld [vmem:[%s2220_s24 + $0x70] sm:$0xff]  ;;  %1815 = vmatprep.subr.bf16.mxu0 %v1916_v36 }
  0x1d   : > { %1791 = vmatprep.subr.bf16.mxu1 %v1912_v16  ;;  %v357_v29 = vpack.c.bf16 %v348_v27, %v347_v26  ;;  %v350_v31 = vld [vmem:[%s2220_s24 + $0x78] sm:$0xff]  ;;  %s1433_s24 = sshll.u32 %s2534_s25, 4  ;;  %s2597_s24 = int_to_ptr.vmem [resolvable:$true] %s1433_s24 }
  0x1e   : > { %1768 = vmatmul.mubr.msk.bf16.vlgmr.msra.gmra.mrb[0].mxu0 %vm398_vm0, %v352_v15  ;;  %v358_v32 = vpack.c.bf16 %v350_v31, %v349_v30  ;;  %s2036_s14 = scalar_lea.vmem %s2597_s24, 1024  ;;  %p2043_p0 = scmp.lt.s32.totalorder %s2597_s24, %s2041_s17 }
  0x1f   : > { %1771 = vmatprep.mubr.msk.bf16.mxu0 %vm398_vm0, %v353_v17  ;;  %1816 = vmatpush3.bf16.msra.mxu0 %v1916_v36  ;;  %p2037_p11 = scmp.ne.s32.totalorder %s2597_s24, %s2036_s14  ;;  %p2044_p1 = scmp.lt.s32.totalorder %s2042_s21, %s2036_s14 }
  0x20   : > { %1792 = vmatpush3.bf16.msra.mxu1 %v1912_v16  ;;  %1817 = vmatprep.subr.bf16.mxu0 %v1917_v37 }
  0x21   : > { %1793 = vmatprep.subr.bf16.mxu1 %v1913_v33  ;;  %p2038_p12 = pnand %p2037_p11, %p2191_p5  ;;  %p2045_p2 = por %p2044_p1, %p2043_p0 }
  0x23   : > { %1818 = vmatpush3.bf16.msra.mxu0 %v1917_v37  ;;  %p2039_p13 = pneg %p2038_p12 }
  0x24   : > { %1794 = vmatpush3.bf16.msra.mxu1 %v1913_v33  ;;  %1819 = vmatprep.subr.bf16.mxu0 %v1918_v38 }
  0x25   : > { %1795 = vmatprep.subr.bf16.mxu1 %v1914_v34  ;;  %p2046_p3 = pnand %p2045_p2, %p2039_p13 }
  0x26   : > { %1772 = vmatmul.mubr.msk.bf16.gmra.mrb[4].mxu0 %vm398_vm0, %v354_v22 }
  0x27   : > { %1775 = vmatprep.mubr.msk.bf16.mxu0 %vm398_vm0, %v355_v23  ;;  %1820 = vmatpush3.bf16.msra.mxu0 %v1918_v38 }
  0x28   : > { %1796 = vmatpush3.bf16.msra.mxu1 %v1914_v34  ;;  %1821 = vmatprep.subr.bf16.mxu0 %v1919_v39 }
  0x29   : > { %1797 = vmatprep.subr.bf16.mxu1 %v1915_v35 }
  0x2b   : > { %1822 = vmatpush3.bf16.msra.mxu0 %v1919_v39 }
  0x2c   : > { %1798 = vmatpush3.bf16.msra.mxu1 %v1915_v35 }
  0x2e   : > { %1776 = vmatmul.mubr.msk.bf16.gmra.mrb[8].mxu0 %vm398_vm0, %v356_v28 }
  0x2f   : > { %1779 = vmatprep.mubr.msk.bf16.mxu0 %vm398_vm0, %v357_v29 }
  0x36   : > { %1780 = vmatmul.mubr.msk.bf16.gmra.mrb[12].mxu0 %vm398_vm0, %v358_v32 }
  0xf1   : > { %v1769_v41 = vpop.f32.mrb[0].mxu0 }
  0xf2   : > { %v466_v42 = vadd.f32 %v1769_v41, %v2282_v40  ;;  %v457_v43 = vpop.f32.mrb[1].mxu0 }
  0xf3   : > { %v458_v44 = vadd.f32 %v2282_v40, %v457_v43  ;;  %v1770_v45 = vpop.f32.mrb[2].mxu0 }
  0xf4   : > { %v538_v46 = vmul.f32 0.01, %v466_v42  ;;  %v469_v47 = vadd.f32 %v1770_v45, %v2282_v40  ;;  %v460_v48 = vpop.f32.mrb[3].mxu0  ;;  %vm522_vm1 = vcmp.gt.f32.partialorder %v466_v42, 0.0 }
  0xf5   : > { %v536_v49 = vmul.f32 0.01, %v458_v44  ;;  %v461_v50 = vadd.f32 %v2282_v40, %v460_v48  ;;  %vm520_vm3 = vcmp.gt.f32.partialorder %v458_v44, 0.0 }
  0xf6   : > { %vm523_vm2 = vcmp.gt.f32.partialorder %v469_v47, 0.0  ;;  %v539_v51 = vmul.f32 0.01, %v469_v47  ;;  %v554_v53 = vsel %vm522_vm1, %v466_v42, %v538_v46 }
  0xf7   : > { %v537_v52 = vmul.f32 0.01, %v461_v50  ;;  %vm521_vm4 = vcmp.gt.f32.partialorder %v461_v50, 0.0  ;;  %v552_v56 = vsel %vm520_vm3, %v458_v44, %v536_v49 }
  0xf8   : > { %v555_v54 = vsel %vm523_vm2, %v469_v47, %v539_v51  ;;  %v1922_v51 = vld [vmem:[%s2648_s5 + $0x30] sm:$0xff]  }
  0xf9   : > { %v1773_v55 = vpop.f32.mrb[4].mxu0  ;;  %v553_v57 = vsel %vm521_vm4, %v461_v50, %v537_v52  ;;  %v569_v58 = vpack.c.bf16 %v555_v54, %v554_v53  ;;  %v1920_v50 = vld [vmem:[%s2648_s5 + $0x20] sm:$0xff]   ;;  %v1923_v52 = vld [vmem:[%s2648_s5 + $0x38] sm:$0xff]  }
  0xfa   : > { %v482_v59 = vadd.f32 %v1773_v55, %v2282_v40  ;;  %v473_v60 = vpop.f32.mrb[5].mxu0  ;;  %v568_v61 = vpack.c.bf16 %v553_v57, %v552_v56  ;;  %1823 = vmatprep.subr.bf16.mxu0 %v1920_v50  ;;  %v1924_v53 = vld [vmem:[%s2650_s7 + $0x40] sm:$0xff]   ;;  %v2323_v55 = vld [vmem:[%s2650_s7 + $0x48] sm:$0xff]   ;;  %v2335_v57 = vld [vmem:[%s2650_s7 + $0x50] sm:$0xff]  }
  0xfb   : > { %v474_v62 = vadd.f32 %v2282_v40, %v473_v60  ;;  %v1774_v63 = vpop.f32.mrb[6].mxu0  ;;  %1824 = vmatpush3.bf16.msra.mxu0 %v1920_v50  ;;  %v2318_v54 = vld [vmem:[%s2650_s7] sm:$0xff]   ;;  %1847 = vmatprep.subr.bf16.mxu1 %v1924_v53  ;;  %v2330_v56 = vld [vmem:[%s2650_s7 + $0x8] sm:$0xff]   ;;  %v2354_v60 = vld [vmem:[%s2650_s7 + $0x18] sm:$0xff]  }
  0xfc   : > { %v542_v0 = vmul.f32 0.01, %v482_v59  ;;  %v485_v1 = vadd.f32 %v1774_v63, %v2282_v40  ;;  %v476_v2 = vpop.f32.mrb[7].mxu0  ;;  %1799 = vmatprep.mubr.bf16.mxu1 %v568_v61  ;;  %vm526_vm5 = vcmp.gt.f32.partialorder %v482_v59, 0.0  ;;  %v2359_v61 = vld [vmem:[%s2650_s7 + $0x60] sm:$0xff]   ;;  %v2371_v63 = vld [vmem:[%s2650_s7 + $0x68] sm:$0xff]  }
  0xfd   : > { %v540_v3 = vmul.f32 0.01, %v474_v62  ;;  %v477_v4 = vadd.f32 %v2282_v40, %v476_v2  ;;  %1800 = vmatmul.mubr.bf16.vlgmr.msra.gmra.mrb[0].mxu1 %v569_v58  ;;  %vm524_vm6 = vcmp.gt.f32.partialorder %v474_v62, 0.0  ;;  %v2342_v58 = vld [vmem:[%s2650_s7 + $0x10] sm:$0xff]  }
  0xfe   : > { %vm527_vm7 = vcmp.gt.f32.partialorder %v485_v1, 0.0  ;;  %v543_v5 = vmul.f32 0.01, %v485_v1  ;;  %v558_v7 = vsel %vm526_vm5, %v482_v59, %v542_v0  ;;  %1855 = vmatpush3.bf16.msra.mxu1 %v2318_v54  ;;  %v2347_v59 = vld [vmem:[%s2650_s7 + $0x58] sm:$0xff]   ;;  %v2378_v0 = vld [vmem:[%s2647_s4] ss:$0 sm:$0xff] }
  0xff   : > { %vm525_vm8 = vcmp.gt.f32.partialorder %v477_v4, 0.0  ;;  %v541_v6 = vmul.f32 0.01, %v477_v4  ;;  %v556_v10 = vsel %vm524_vm6, %v474_v62, %v540_v3  ;;  %1848 = vmatprep.subr.bf16.mxu1 %v2323_v55  ;;  %v2366_v62 = vld [vmem:[%s2650_s7 + $0x20] sm:$0xff]  }
 0x100   : > { %v559_v8 = vsel %vm527_vm7, %v485_v1, %v543_v5 }
 0x101   : > { %v1777_v9 = vpop.f32.mrb[8].mxu0  ;;  %v557_v11 = vsel %vm525_vm8, %v477_v4, %v541_v6  ;;  %v571_v12 = vpack.c.bf16 %v559_v8, %v558_v7 }
 0x102   : > { %v498_v13 = vadd.f32 %v1777_v9, %v2282_v40  ;;  %v489_v14 = vpop.f32.mrb[9].mxu0  ;;  %v570_v15 = vpack.c.bf16 %v557_v11, %v556_v10  ;;  %1856 = vmatpush3.bf16.msra.mxu1 %v2330_v56 }
 0x103   : > { %v490_v16 = vadd.f32 %v2282_v40, %v489_v14  ;;  %v1778_v17 = vpop.f32.mrb[10].mxu0  ;;  %1849 = vmatprep.subr.bf16.mxu1 %v2335_v57 }
 0x104   : > { %v546_v18 = vmul.f32 0.01, %v498_v13  ;;  %v501_v19 = vadd.f32 %v1778_v17, %v2282_v40  ;;  %v492_v20 = vpop.f32.mrb[11].mxu0  ;;  %1803 = vmatprep.mubr.bf16.mxu1 %v570_v15  ;;  %vm530_vm9 = vcmp.gt.f32.partialorder %v498_v13, 0.0 }
 0x105   : > { %v544_v21 = vmul.f32 0.01, %v490_v16  ;;  %v493_v22 = vadd.f32 %v2282_v40, %v492_v20  ;;  %1804 = vmatmul.mubr.bf16.gmra.mrb[4].mxu1 %v571_v12  ;;  %vm528_vm10 = vcmp.gt.f32.partialorder %v490_v16, 0.0 }
 0x106   : > { %vm531_vm11 = vcmp.gt.f32.partialorder %v501_v19, 0.0  ;;  %v547_v23 = vmul.f32 0.01, %v501_v19  ;;  %v562_v25 = vsel %vm530_vm9, %v498_v13, %v546_v18  ;;  %1857 = vmatpush3.bf16.msra.mxu1 %v2342_v58 }
 0x107   : > { %vm529_vm12 = vcmp.gt.f32.partialorder %v493_v22, 0.0  ;;  %v545_v24 = vmul.f32 0.01, %v493_v22  ;;  %v560_v28 = vsel %vm528_vm10, %v490_v16, %v544_v21  ;;  %1850 = vmatprep.subr.bf16.mxu1 %v2347_v59 }
 0x108   : > { %v563_v26 = vsel %vm531_vm11, %v501_v19, %v547_v23 }
 0x109   : > { %v1781_v27 = vpop.f32.mrb[12].mxu0  ;;  %v561_v29 = vsel %vm529_vm12, %v493_v22, %v545_v24  ;;  %v573_v30 = vpack.c.bf16 %v563_v26, %v562_v25 }
 0x10a   : > { %v514_v31 = vadd.f32 %v1781_v27, %v2282_v40  ;;  %v505_v32 = vpop.f32.mrb[13].mxu0  ;;  %v572_v33 = vpack.c.bf16 %v561_v29, %v560_v28  ;;  %1858 = vmatpush3.bf16.msra.mxu1 %v2354_v60 }
 0x10b   : > { %v506_v34 = vadd.f32 %v2282_v40, %v505_v32  ;;  %v1782_v35 = vpop.f32.mrb[14].mxu0  ;;  %1851 = vmatprep.subr.bf16.mxu1 %v2359_v61 }
 0x10c   : > { %vm534_vm13 = vcmp.gt.f32.partialorder %v514_v31, 0.0  ;;  %v550_v36 = vmul.f32 0.01, %v514_v31  ;;  %v517_v37 = vadd.f32 %v1782_v35, %v2282_v40  ;;  %v508_v38 = vpop.f32.mrb[15].mxu0  ;;  %1807 = vmatprep.mubr.bf16.mxu1 %v572_v33 }
 0x10d   : > { %vm532_vm14 = vcmp.gt.f32.partialorder %v506_v34, 0.0  ;;  %v548_v39 = vmul.f32 0.01, %v506_v34  ;;  %v509_v41 = vadd.f32 %v2282_v40, %v508_v38  ;;  %1808 = vmatmul.mubr.bf16.gmra.mrb[8].mxu1 %v573_v30  ;;  %v1921_v40 = vld [vmem:[%s2648_s5 + $0x28] sm:$0xff]  }
 0x10e   : > { %vm535_vm15 = vcmp.gt.f32.partialorder %v517_v37, 0.0  ;;  %v551_v42 = vmul.f32 0.01, %v517_v37  ;;  %v566_v43 = vsel %vm534_vm13, %v514_v31, %v550_v36  ;;  %1825 = vmatprep.subr.bf16.mxu0 %v1921_v40  ;;  %1859 = vmatpush3.bf16.msra.mxu1 %v2366_v62 }
 0x10f   : > { %vm533_vm0 = vcmp.gt.f32.partialorder %v509_v41, 0.0  ;;  %v549_v44 = vmul.f32 0.01, %v509_v41  ;;  %v564_v45 = vsel %vm532_vm14, %v506_v34, %v548_v39  ;;  %1826 = vmatpush3.bf16.msra.mxu0 %v1921_v40  ;;  %1852 = vmatprep.subr.bf16.mxu1 %v2371_v63 }
 0x110   : > { %v567_v46 = vsel %vm535_vm15, %v517_v37, %v551_v42  ;;  %1827 = vmatprep.subr.bf16.mxu0 %v1922_v51 }
 0x111   : > { %v565_v47 = vsel %vm533_vm0, %v509_v41, %v549_v44  ;;  %v575_v48 = vpack.c.bf16 %v567_v46, %v566_v43 }
 0x112   : > { %v574_v49 = vpack.c.bf16 %v565_v47, %v564_v45 }
 0x113   : > { %1828 = vmatpush3.bf16.msra.mxu0 %v1922_v51 }
 0x114   : > { %1811 = vmatprep.mubr.bf16.mxu1 %v574_v49  ;;  %1829 = vmatprep.subr.bf16.mxu0 %v1923_v52 }
 0x115   : > { %1812 = vmatmul.mubr.bf16.gmra.mrb[12].mxu1 %v575_v48 }
 0x117   : > { %1830 = vmatpush3.bf16.msra.mxu0 %v1923_v52 }
 0x118   : > { %1695 = vmatprep.subr.bf16.mxu0 %v1924_v53 }
 0x1d0   : > { %v1801_v1 = vpop.f32.mrb[0].mxu1 }
 0x1d1   : > { %v690_v2 = vadd.f32 %v1801_v1, %v2378_v0  ;;  %v681_v3 = vpop.f32.mrb[1].mxu1 }
 0x1d2   : > { %v682_v4 = vadd.f32 %v2378_v0, %v681_v3  ;;  %v1802_v5 = vpop.f32.mrb[2].mxu1 }
 0x1d3   : > { %1940 = vtanh.f32 %v690_v2  ;;  %v693_v6 = vadd.f32 %v1802_v5, %v2378_v0  ;;  %v684_v7 = vpop.f32.mrb[3].mxu1 }
 0x1d4   : > { %1942 = vtanh.f32 %v682_v4  ;;  %v685_v8 = vadd.f32 %v2378_v0, %v684_v7 }
 0x1d5   : > { %1944 = vtanh.f32 %v693_v6 }
 0x1d6   : > { %1946 = vtanh.f32 %v685_v8 }
 0x1d8   : > { %v1805_v9 = vpop.f32.mrb[4].mxu1 }
 0x1d9   : > { %v706_v10 = vadd.f32 %v1805_v9, %v2378_v0  ;;  %v697_v11 = vpop.f32.mrb[5].mxu1 }
 0x1da   : > { %v698_v12 = vadd.f32 %v2378_v0, %v697_v11  ;;  %v1806_v13 = vpop.f32.mrb[6].mxu1 }
 0x1db   : > { %1948 = vtanh.f32 %v706_v10  ;;  %v709_v14 = vadd.f32 %v1806_v13, %v2378_v0  ;;  %v700_v15 = vpop.f32.mrb[7].mxu1 }
 0x1dc   : > { %1950 = vtanh.f32 %v698_v12  ;;  %v701_v16 = vadd.f32 %v2378_v0, %v700_v15 }
 0x1dd   : > { %v1941_v17 = vpop.eup %1940  ;;  %1952 = vtanh.f32 %v709_v14 }
 0x1de   : > { %v1943_v18 = vpop.eup %1942  ;;  %1954 = vtanh.f32 %v701_v16 }
 0x1df   : > { %v1945_v19 = vpop.eup %1944 }
 0x1e0   : > { %v1947_v20 = vpop.eup %1946  ;;  %v1809_v21 = vpop.f32.mrb[8].mxu1  ;;  %v2388_v22 = vpack.c.bf16 %v1945_v19, %v1941_v17 }
 0x1e1   : > { %v722_v23 = vadd.f32 %v1809_v21, %v2378_v0  ;;  %v713_v24 = vpop.f32.mrb[9].mxu1  ;;  %v760_v25 = vpack.c.bf16 %v1947_v20, %v1943_v18 }
 0x1e2   : > { %v714_v26 = vadd.f32 %v2378_v0, %v713_v24  ;;  %v1810_v27 = vpop.f32.mrb[10].mxu1 }
 0x1e3   : > { %1956 = vtanh.f32 %v722_v23  ;;  %v725_v28 = vadd.f32 %v1810_v27, %v2378_v0  ;;  %v716_v29 = vpop.f32.mrb[11].mxu1  ;;  %1831 = vmatprep.mubr.bf16.mxu0 %v760_v25 }
 0x1e4   : > { %1958 = vtanh.f32 %v714_v26  ;;  %v717_v30 = vadd.f32 %v2378_v0, %v716_v29  ;;  %1832 = vmatmul.mubr.bf16.vlgmr.msra.gmra.mrb[16].mxu0 %v2388_v22 }
 0x1e5   : > { %v1949_v31 = vpop.eup %1948  ;;  %1960 = vtanh.f32 %v725_v28  ;;  %1696 = vmatpush3.bf16.msra.mxu0 %v2318_v54 }
 0x1e6   : > { %v1951_v32 = vpop.eup %1950  ;;  %1962 = vtanh.f32 %v717_v30  ;;  %1697 = vmatprep.subr.bf16.mxu0 %v2323_v55 }
 0x1e7   : > { %v1953_v33 = vpop.eup %1952 }
 0x1e8   : > { %v1955_v34 = vpop.eup %1954  ;;  %v1813_v35 = vpop.f32.mrb[12].mxu1  ;;  %v763_v36 = vpack.c.bf16 %v1953_v33, %v1949_v31 }
 0x1e9   : > { %v738_v37 = vadd.f32 %v1813_v35, %v2378_v0  ;;  %v729_v38 = vpop.f32.mrb[13].mxu1  ;;  %v2398_v39 = vpack.c.bf16 %v1955_v34, %v1951_v32  ;;  %1698 = vmatpush3.bf16.msra.mxu0 %v2330_v56 }
 0x1ea   : > { %v730_v41 = vadd.f32 %v2378_v0, %v729_v38  ;;  %v1814_v42 = vpop.f32.mrb[14].mxu1  ;;  %1183 = vmatprep.mubr.bf16.mxu1 %v763_v36  ;;  %1699 = vmatprep.subr.bf16.mxu0 %v2335_v57  ;;  %v1935_v57 = vld [vmem:[%s2650_s7 + $0x28] sm:$0xff]  }
 0x1eb   : > { %1964 = vtanh.f32 %v738_v37  ;;  %v741_v43 = vadd.f32 %v1814_v42, %v2378_v0  ;;  %v732_v44 = vpop.f32.mrb[15].mxu1  ;;  %1835 = vmatprep.mubr.bf16.mxu0 %v2398_v39  ;;  %1860 = vmatpush3.bf16.msra.mxu1 %v1935_v57 }
 0x1ec   : > { %1966 = vtanh.f32 %v730_v41  ;;  %v733_v45 = vadd.f32 %v2378_v0, %v732_v44  ;;  %1836 = vmatmul.mubr.bf16.gmra.mrb[20].mxu0 %v763_v36 }
 0x1ed   : > { %v1957_v46 = vpop.eup %1956  ;;  %1968 = vtanh.f32 %v741_v43  ;;  %1700 = vmatpush3.bf16.msra.mxu0 %v2342_v58  ;;  %v1936_v58 = vld [vmem:[%s2650_s7 + $0x70] sm:$0xff]  }
 0x1ee   : > { %v1959_v47 = vpop.eup %1958  ;;  %1970 = vtanh.f32 %v733_v45  ;;  %1701 = vmatprep.subr.bf16.mxu0 %v2347_v59  ;;  %v1937_v59 = vld [vmem:[%s2650_s7 + $0x30] sm:$0xff]   ;;  %1853 = vmatprep.subr.bf16.mxu1 %v1936_v58 }
 0x1ef   : > { %v1961_v48 = vpop.eup %1960  ;;  %1861 = vmatpush3.bf16.msra.mxu1 %v1937_v59 }
 0x1f0   : > { %v1963_v49 = vpop.eup %1962  ;;  %v2408_v50 = vpack.c.bf16 %v1961_v48, %v1957_v46 }
 0x1f1   : > { %v2410_v40 = vpack.c.bf16 %v1963_v49, %v1959_v47  ;;  %1702 = vmatpush3.bf16.msra.mxu0 %v2354_v60  ;;  %v1938_v60 = vld [vmem:[%s2650_s7 + $0x78] sm:$0xff]  }
 0x1f2   : > { %1703 = vmatprep.subr.bf16.mxu0 %v2359_v61  ;;  %v1939_v61 = vld [vmem:[%s2650_s7 + $0x38] sm:$0xff]   ;;  %1854 = vmatprep.subr.bf16.mxu1 %v1938_v60 }
 0x1f3   : > { %1839 = vmatprep.mubr.bf16.mxu0 %v2410_v40  ;;  %1862 = vmatpush3.bf16.msra.mxu1 %v1939_v61 }
 0x1f4   : > { %1840 = vmatmul.mubr.bf16.gmra.mrb[24].mxu0 %v2408_v50 }
 0x1f5   : > { %v1965_v51 = vpop.eup %1964  ;;  %1704 = vmatpush3.bf16.msra.mxu0 %v2366_v62  ;;  %v2442_v62 = vld [vmem:[%s2649_s6] ss:$0 sm:$0xff] }
 0x1f6   : > { %v1967_v52 = vpop.eup %1966  ;;  %1705 = vmatprep.subr.bf16.mxu0 %v2371_v63 }
 0x1f7   : > { %v1969_v53 = vpop.eup %1968 }
 0x1f8   : > { %v1971_v54 = vpop.eup %1970  ;;  %v2418_v55 = vpack.c.bf16 %v1969_v53, %v1965_v51 }
 0x1f9   : > { %v2420_v56 = vpack.c.bf16 %v1971_v54, %v1967_v52  ;;  %1706 = vmatpush3.bf16.msra.mxu0 %v1935_v57 }
 0x1fa   : > { %1707 = vmatprep.subr.bf16.mxu0 %v1936_v58 }
 0x1fb   : > { %1843 = vmatprep.mubr.bf16.mxu0 %v2420_v56 }
 0x1fc   : > { %1844 = vmatmul.mubr.bf16.gmra.mrb[28].mxu0 %v2418_v55 }
 0x1fd   : > { %1159 = vmatprep.mubr.bf16.mxu0 %v760_v25  ;;  %1708 = vmatpush3.bf16.msra.mxu0 %v1937_v59 }
 0x1fe   : > { %1709 = vmatprep.subr.bf16.mxu0 %v1938_v60 }
 0x201   : > { %1710 = vmatpush3.bf16.msra.mxu0 %v1939_v61 }
 0x2b7   : > { %v1833_v63 = vpop.f32.mrb[16].mxu0 }
 0x2b8   : > { %v882_v0 = vadd.f32 %v1833_v63, %v2442_v62  ;;  %v873_v1 = vpop.f32.mrb[17].mxu0 }
 0x2b9   : > { %v874_v2 = vadd.f32 %v2442_v62, %v873_v1  ;;  %v1834_v3 = vpop.f32.mrb[18].mxu0 }
 0x2ba   : > { %v954_v4 = vmul.f32 0.01, %v882_v0  ;;  %v885_v5 = vadd.f32 %v1834_v3, %v2442_v62  ;;  %v876_v6 = vpop.f32.mrb[19].mxu0  ;;  %vm938_vm1 = vcmp.gt.f32.partialorder %v882_v0, 0.0 }
 0x2bb   : > { %v952_v7 = vmul.f32 0.01, %v874_v2  ;;  %v877_v8 = vadd.f32 %v2442_v62, %v876_v6  ;;  %vm936_vm2 = vcmp.gt.f32.partialorder %v874_v2, 0.0 }
 0x2bc   : > { %vm939_vm3 = vcmp.gt.f32.partialorder %v885_v5, 0.0  ;;  %v955_v9 = vmul.f32 0.01, %v885_v5  ;;  %v970_v11 = vsel %vm938_vm1, %v882_v0, %v954_v4 }
 0x2bd   : > { %vm937_vm4 = vcmp.gt.f32.partialorder %v877_v8, 0.0  ;;  %v953_v10 = vmul.f32 0.01, %v877_v8  ;;  %v968_v13 = vsel %vm936_vm2, %v874_v2, %v952_v7 }
 0x2be   : > { %v971_v12 = vsel %vm939_vm3, %v885_v5, %v955_v9 }
 0x2bf   : > { %v969_v14 = vsel %vm937_vm4, %v877_v8, %v953_v10  ;;  %v1837_v15 = vpop.f32.mrb[20].mxu0  ;;  %v985_v16 = vpack.c.bf16 %v971_v12, %v970_v11 }
 0x2c0   : > { %v984_v17 = vpack.c.bf16 %v969_v14, %v968_v13  ;;  %v898_v18 = vadd.f32 %v1837_v15, %v2442_v62  ;;  %v889_v19 = vpop.f32.mrb[21].mxu0 }
 0x2c1   : > { %v890_v20 = vadd.f32 %v2442_v62, %v889_v19  ;;  %v1838_v21 = vpop.f32.mrb[22].mxu0 }
 0x2c2   : > { %v958_v23 = vmul.f32 0.01, %v898_v18  ;;  %v901_v24 = vadd.f32 %v1838_v21, %v2442_v62  ;;  %v892_v25 = vpop.f32.mrb[23].mxu0  ;;  %1160 = vmatmul.mubr.bf16.vlgmr.msra.gmra.mrb[32].mxu0 %v984_v17  ;;  %vm942_vm5 = vcmp.gt.f32.partialorder %v898_v18, 0.0 }
 0x2c3   : > { %v956_v26 = vmul.f32 0.01, %v890_v20  ;;  %v893_v27 = vadd.f32 %v2442_v62, %v892_v25  ;;  %1167 = vmatprep.mubr.bf16.mxu0 %v2388_v22  ;;  %vm940_vm6 = vcmp.gt.f32.partialorder %v890_v20, 0.0 }
 0x2c4   : > { %vm943_vm7 = vcmp.gt.f32.partialorder %v901_v24, 0.0  ;;  %v959_v28 = vmul.f32 0.01, %v901_v24  ;;  %v974_v30 = vsel %vm942_vm5, %v898_v18, %v958_v23 }
 0x2c5   : > { %vm941_vm8 = vcmp.gt.f32.partialorder %v893_v27, 0.0  ;;  %v957_v29 = vmul.f32 0.01, %v893_v27  ;;  %v972_v34 = vsel %vm940_vm6, %v890_v20, %v956_v26 }
 0x2c6   : > { %v975_v31 = vsel %vm943_vm7, %v901_v24, %v959_v28 }
 0x2c7   : > { %v987_v32 = vpack.c.bf16 %v975_v31, %v974_v30  ;;  %v1841_v33 = vpop.f32.mrb[24].mxu0  ;;  %v973_v35 = vsel %vm941_vm8, %v893_v27, %v957_v29 }
 0x2c8   : > { %v914_v36 = vadd.f32 %v1841_v33, %v2442_v62  ;;  %v905_v37 = vpop.f32.mrb[25].mxu0  ;;  %v986_v38 = vpack.c.bf16 %v973_v35, %v972_v34 }
 0x2c9   : > { %v906_v41 = vadd.f32 %v2442_v62, %v905_v37  ;;  %v1842_v42 = vpop.f32.mrb[26].mxu0  ;;  %1184 = vmatmul.mubr.bf16.vlgmr.msra.gmra.mrb[16].mxu1 %v987_v32 }
 0x2ca   : > { %v962_v22 = vmul.f32 0.01, %v914_v36  ;;  %v917_v43 = vadd.f32 %v1842_v42, %v2442_v62  ;;  %v908_v44 = vpop.f32.mrb[27].mxu0  ;;  %1168 = vmatmul.mubr.bf16.gmra.mrb[36].mxu0 %v985_v16  ;;  %1191 = vmatprep.mubr.bf16.mxu1 %v2410_v40  ;;  %vm946_vm9 = vcmp.gt.f32.partialorder %v914_v36, 0.0 }
 0x2cb   : > { %v960_v45 = vmul.f32 0.01, %v906_v41  ;;  %v909_v46 = vadd.f32 %v2442_v62, %v908_v44  ;;  %1175 = vmatprep.mubr.bf16.mxu0 %v2398_v39  ;;  %vm944_vm10 = vcmp.gt.f32.partialorder %v906_v41, 0.0 }
 0x2cc   : > { %vm947_vm11 = vcmp.gt.f32.partialorder %v917_v43, 0.0  ;;  %v963_v47 = vmul.f32 0.01, %v917_v43  ;;  %v978_v49 = vsel %vm946_vm9, %v914_v36, %v962_v22 }
 0x2cd   : > { %vm945_vm12 = vcmp.gt.f32.partialorder %v909_v46, 0.0  ;;  %v961_v48 = vmul.f32 0.01, %v909_v46  ;;  %v976_v53 = vsel %vm944_vm10, %v906_v41, %v960_v45 }
 0x2ce   : > { %v979_v51 = vsel %vm947_vm11, %v917_v43, %v963_v47 }
 0x2cf   : > { %v1845_v52 = vpop.f32.mrb[28].mxu0  ;;  %v977_v54 = vsel %vm945_vm12, %v909_v46, %v961_v48  ;;  %v989_v57 = vpack.c.bf16 %v979_v51, %v978_v49 }
 0x2d0   : > { %v930_v58 = vadd.f32 %v1845_v52, %v2442_v62  ;;  %v921_v40 = vpop.f32.mrb[29].mxu0  ;;  %v988_v59 = vpack.c.bf16 %v977_v54, %v976_v53 }
 0x2d1   : > { %v922_v60 = vadd.f32 %v2442_v62, %v921_v40  ;;  %v1846_v61 = vpop.f32.mrb[30].mxu0 }
 0x2d2   : > { %v966_v63 = vmul.f32 0.01, %v930_v58  ;;  %v933_v39 = vadd.f32 %v1846_v61, %v2442_v62  ;;  %v924_v0 = vpop.f32.mrb[31].mxu0  ;;  %1176 = vmatmul.mubr.bf16.gmra.mrb[40].mxu0 %v986_v38  ;;  %1192 = vmatmul.mubr.bf16.gmra.mrb[20].mxu1 %v988_v59  ;;  %vm950_vm13 = vcmp.gt.f32.partialorder %v930_v58, 0.0 }
 0x2d3   : > { %v964_v1 = vmul.f32 0.01, %v922_v60  ;;  %v925_v2 = vadd.f32 %v2442_v62, %v924_v0  ;;  %1199 = vmatprep.mubr.bf16.mxu1 %v2408_v50  ;;  %vm948_vm14 = vcmp.gt.f32.partialorder %v922_v60, 0.0  ;;  %v2469_v50 = vld [vmem:[%s2651_s8] ss:$0 sm:$0xff]  ;;  %v1224_v0 = vlaneseq }
 0x2d4   : > { %vm951_vm15 = vcmp.gt.f32.partialorder %v933_v39, 0.0  ;;  %v967_v3 = vmul.f32 0.01, %v933_v39  ;;  %v982_v5 = vsel %vm950_vm13, %v930_v58, %v966_v63 }
 0x2d5   : > { %vm949_vm0 = vcmp.gt.f32.partialorder %v925_v2, 0.0  ;;  %v965_v4 = vmul.f32 0.01, %v925_v2  ;;  %v980_v7 = vsel %vm948_vm14, %v922_v60, %v964_v1 }
 0x2d6   : > { %v983_v6 = vsel %vm951_vm15, %v933_v39, %v967_v3 }
 0x2d7   : > { %v981_v8 = vsel %vm949_vm0, %v925_v2, %v965_v4  ;;  %v991_v9 = vpack.c.bf16 %v983_v6, %v982_v5 }
 0x2d8   : > { %v990_v10 = vpack.c.bf16 %v981_v8, %v980_v7 }
 0x2da   : > { %1200 = vmatmul.mubr.bf16.gmra.mrb[24].mxu1 %v989_v57 }
 0x2db   : > { %1207 = vmatprep.mubr.bf16.mxu1 %v2420_v56 }
 0x2e2   : > { %1208 = vmatmul.mubr.bf16.gmra.mrb[28].mxu1 %v990_v10 }
 0x2e3   : > { %1215 = vmatprep.mubr.bf16.mxu1 %v2418_v55 }
 0x2ea   : > { %1216 = vmatmul.mubr.bf16.gmra.mrb[32].mxu1 %v991_v9 }
 0x395   : > { %v1711_v62 = vpop.f32.mrb[32].mxu0 }
 0x396   : > { %v1712_v11 = vpop.f32.mrb[33].mxu0 }
 0x397   : > { %v1713_v12 = vadd.f32 %v1712_v11, %v1711_v62  ;;  %v1714_v13 = vpop.f32.mrb[34].mxu0  ;;  %v2511_v62 = vand.u32 127, %v1224_v0 }
 0x398   : > { %v1715_v14 = vpop.f32.mrb[35].mxu0 }
 0x399   : > { %v2472_v15 = vadd.f32 %v1713_v12, %v2469_v50  ;;  %v1716_v16 = vadd.f32 %v1715_v14, %v1714_v13  ;;  %vm1226_vm1 = vcmp.lt.s32.totalorder %v2511_v62, 64 }
 0x39b   : > { %v1550_v56 = vmul.f32 -1.442695, %v2472_v15  ;;  %v2476_v17 = vadd.f32 %v1716_v16, %v2469_v50 }
 0x39c   : > { %v1729_v55 = vpop.f32.mrb[16].mxu1 }
 0x39d   : > { %1972 = vpow2.f32 %v1550_v56  ;;  %v1551_v18 = vmul.f32 -1.442695, %v2476_v17  ;;  %v1717_v19 = vpop.f32.mrb[36].mxu0  ;;  %v1730_v20 = vpop.f32.mrb[17].mxu1 }
 0x39e   : > { %v1731_v21 = vadd.f32 %v1730_v20, %v1729_v55  ;;  %v1718_v23 = vpop.f32.mrb[37].mxu0  ;;  %v1732_v24 = vpop.f32.mrb[18].mxu1 }
 0x39f   : > { %1974 = vpow2.f32 %v1551_v18  ;;  %v1719_v25 = vadd.f32 %v1718_v23, %v1717_v19  ;;  %v1720_v26 = vpop.f32.mrb[38].mxu0  ;;  %v1733_v27 = vpop.f32.mrb[19].mxu1 }
 0x3a0   : > { %v2480_v28 = vadd.f32 %v1731_v21, %v2469_v50  ;;  %v1734_v29 = vadd.f32 %v1733_v27, %v1732_v24  ;;  %v1721_v30 = vpop.f32.mrb[39].mxu0 }
 0x3a1   : > { %v2483_v31 = vadd.f32 %v1719_v25, %v2469_v50  ;;  %v1722_v32 = vadd.f32 %v1721_v30, %v1720_v26 }
 0x3a2   : > { %v1556_v33 = vmul.f32 -1.442695, %v2480_v28  ;;  %v2487_v34 = vadd.f32 %v1734_v29, %v2469_v50 }
 0x3a3   : > { %v1552_v35 = vmul.f32 -1.442695, %v2483_v31  ;;  %v2491_v36 = vadd.f32 %v1722_v32, %v2469_v50 }
 0x3a4   : > { %1976 = vpow2.f32 %v1556_v33  ;;  %v1557_v37 = vmul.f32 -1.442695, %v2487_v34 }
 0x3a5   : > { %1978 = vpow2.f32 %v1552_v35  ;;  %v1553_v38 = vmul.f32 -1.442695, %v2491_v36  ;;  %v1723_v41 = vpop.f32.mrb[40].mxu0  ;;  %v1735_v42 = vpop.f32.mrb[20].mxu1 }
 0x3a6   : > { %1980 = vpow2.f32 %v1557_v37  ;;  %v1724_v22 = vpop.f32.mrb[41].mxu0  ;;  %v1736_v43 = vpop.f32.mrb[21].mxu1 }
 0x3a7   : > { %v1973_v44 = vpop.eup %1972  ;;  %1982 = vpow2.f32 %v1553_v38  ;;  %v1725_v45 = vadd.f32 %v1724_v22, %v1723_v41  ;;  %v1737_v46 = vadd.f32 %v1736_v43, %v1735_v42  ;;  %v1726_v47 = vpop.f32.mrb[42].mxu0 }
 0x3a8   : > { %v1738_v48 = vpop.f32.mrb[22].mxu1  ;;  %v1275_v49 = vadd.f32 1.0, %v1973_v44  ;;  %v1727_v51 = vpop.f32.mrb[43].mxu0 }
 0x3a9   : > { %v1739_v52 = vpop.f32.mrb[23].mxu1  ;;  %v1975_v53 = vpop.eup %1974  ;;  %v2496_v54 = vadd.f32 %v1725_v45, %v2469_v50  ;;  %v2499_v57 = vadd.f32 %v1737_v46, %v2469_v50  ;;  %v1728_v58 = vadd.f32 %v1727_v51, %v1726_v47 }
 0x3aa   : > { %v1740_v40 = vadd.f32 %v1739_v52, %v1738_v48  ;;  %1984 = vrcp.f32 %v1275_v49  ;;  %v1276_v59 = vadd.f32 1.0, %v1975_v53 }
 0x3ab   : > { %v1554_v60 = vmul.f32 -1.442695, %v2496_v54  ;;  %v1558_v61 = vmul.f32 -1.442695, %v2499_v57  ;;  %v2504_v63 = vadd.f32 %v1728_v58, %v2469_v50 }
 0x3ac   : > { %v2507_v39 = vadd.f32 %v1740_v40, %v2469_v50  ;;  %1986 = vrcp.f32 %v1276_v59 }
 0x3ad   : > { %1988 = vpow2.f32 %v1554_v60  ;;  %v1555_v1 = vmul.f32 -1.442695, %v2504_v63  ;;  %v1741_v3 = vpop.f32.mrb[24].mxu1 }
 0x3ae   : > { %v1559_v2 = vmul.f32 -1.442695, %v2507_v39  ;;  %v1977_v4 = vpop.eup %1976  ;;  %1990 = vpow2.f32 %v1558_v61  ;;  %v1742_v5 = vpop.f32.mrb[25].mxu1 }
 0x3af   : > { %v1979_v6 = vpop.eup %1978  ;;  %v1281_v7 = vadd.f32 1.0, %v1977_v4  ;;  %1992 = vpow2.f32 %v1555_v1  ;;  %v1743_v8 = vadd.f32 %v1742_v5, %v1741_v3  ;;  %v1744_v9 = vpop.f32.mrb[26].mxu1 }
 0x3b0   : > { %v1981_v10 = vpop.eup %1980  ;;  %v1277_v11 = vadd.f32 1.0, %v1979_v6  ;;  %1994 = vpow2.f32 %v1559_v2  ;;  %v1745_v12 = vpop.f32.mrb[27].mxu1 }
 0x3b1   : > { %v1983_v13 = vpop.eup %1982  ;;  %1996 = vrcp.f32 %v1281_v7  ;;  %v1282_v14 = vadd.f32 1.0, %v1981_v10  ;;  %v2515_v16 = vadd.f32 %v1743_v8, %v2469_v50  ;;  %v1746_v56 = vadd.f32 %v1745_v12, %v1744_v9 }
 0x3b2   : > { %1998 = vrcp.f32 %v1277_v11  ;;  %v1278_v55 = vadd.f32 1.0, %v1983_v13 }
 0x3b3   : > { %2000 = vrcp.f32 %v1282_v14  ;;  %v1560_v18 = vmul.f32 -1.442695, %v2515_v16  ;;  %v2519_v19 = vadd.f32 %v1746_v56, %v2469_v50 }
 0x3b4   : > { %v1985_v20 = vpop.eup %1984  ;;  %2002 = vrcp.f32 %v1278_v55 }
 0x3b5   : > { %2004 = vpow2.f32 %v1560_v18  ;;  %v1561_v21 = vmul.f32 -1.442695, %v2519_v19  ;;  %v1747_v23 = vpop.f32.mrb[28].mxu1  ;;  %v1323_v27 = vsel %vm1226_vm1, %v1985_v20, %v2472_v15 }
 0x3b6   : > { %v1987_v24 = vpop.eup %1986  ;;  %v1748_v25 = vpop.f32.mrb[29].mxu1 }
 0x3b7   : > { %v1989_v26 = vpop.eup %1988  ;;  %v1324_v29 = vsel %vm1226_vm1, %v1987_v24, %v2476_v17  ;;  %2006 = vpow2.f32 %v1561_v21  ;;  %v1749_v30 = vadd.f32 %v1748_v25, %v1747_v23  ;;  %v1750_v32 = vpop.f32.mrb[30].mxu1 }
 0x3b8   : > { %v1991_v33 = vpop.eup %1990  ;;  %v1607_v35 = vpack.c.bf16 %v1324_v29, %v1323_v27  ;;  %v1279_v37 = vadd.f32 1.0, %v1989_v26  ;;  %v1751_v38 = vpop.f32.mrb[31].mxu1 }
 0x3b9   : > { %v1993_v41 = vpop.eup %1992  ;;  %v1283_v42 = vadd.f32 1.0, %v1991_v33  ;;  %v2532_v22 = vadd.f32 %v1749_v30, %v2469_v50  ;;  %v1752_v43 = vadd.f32 %v1751_v38, %v1750_v32 }
 0x3ba   : > { %v1995_v44 = vpop.eup %1994  ;;  %1608 = vst [vmem:[%s2534_s25] sm:$0xff] %v1607_v35   ;;  %2008 = vrcp.f32 %v1279_v37  ;;  %v1280_v15 = vadd.f32 1.0, %v1993_v41 }
 0x3bb   : > { %v1997_v17 = vpop.eup %1996  ;;  %2010 = vrcp.f32 %v1283_v42  ;;  %v1284_v45 = vadd.f32 1.0, %v1995_v44  ;;  %v1562_v46 = vmul.f32 -1.442695, %v2532_v22  ;;  %v2539_v47 = vadd.f32 %v1752_v43, %v2469_v50 }
 0x3bc   : > { %v1999_v48 = vpop.eup %1998  ;;  %2012 = vrcp.f32 %v1280_v15  ;;  %v1329_v58 = vsel %vm1226_vm1, %v1997_v17, %v2480_v28 }
 0x3bd   : > { %v2001_v49 = vpop.eup %2000  ;;  %2014 = vrcp.f32 %v1284_v45  ;;  %v1563_v51 = vmul.f32 -1.442695, %v2539_v47  ;;  %v1753_v52 = vpop.f32.mrb[32].mxu1  ;;  %v1325_v40 = vsel %vm1226_vm1, %v1999_v48, %v2483_v31 }
 0x3be   : > { %v2003_v53 = vpop.eup %2002  ;;  %v1330_v59 = vsel %vm1226_vm1, %v2001_v49, %v2487_v34  ;;  %2016 = vpow2.f32 %v1562_v46  ;;  %v1754_v60 = vpop.f32.mrb[33].mxu1 }
 0x3bf   : > { %v2005_v61 = vpop.eup %2004  ;;  %v1622_v0 = vpack.c.bf16 %v1330_v59, %v1329_v58  ;;  %v1326_v1 = vsel %vm1226_vm1, %v2003_v53, %v2491_v36  ;;  %2018 = vpow2.f32 %v1563_v51  ;;  %v1755_v2 = vadd.f32 %v1754_v60, %v1753_v52  ;;  %v1756_v28 = vpop.f32.mrb[34].mxu1 }
 0x3c0   : > { %v1612_v3 = vpack.c.bf16 %v1326_v1, %v1325_v40  ;;  %v1285_v4 = vadd.f32 1.0, %v2005_v61  ;;  %v1757_v5 = vpop.f32.mrb[35].mxu1 }
 0x3c1   : > { %v2007_v31 = vpop.eup %2006  ;;  %1646 = vst [vmem:[%s2534_s25 + $0x18] sm:$0xff] %v1622_v0   ;;  %v1218_v6 = vadd.f32 %v1755_v2, %v2469_v50  ;;  %v1758_v34 = vadd.f32 %v1757_v5, %v1756_v28 }
 0x3c2   : > { %1644 = vst [vmem:[%s2534_s25 + $0x8] sm:$0xff] %v1612_v3   ;;  %2020 = vrcp.f32 %v1285_v4  ;;  %v1286_v7 = vadd.f32 1.0, %v2007_v31 }
 0x3c3   : > { %v1564_v8 = vmul.f32 -1.442695, %v1218_v6  ;;  %v1221_v9 = vadd.f32 %v1758_v34, %v2469_v50 }
 0x3c4   : > { %v2009_v10 = vpop.eup %2008  ;;  %2022 = vrcp.f32 %v1286_v7 }
 0x3c5   : > { %v2011_v36 = vpop.eup %2010  ;;  %2024 = vpow2.f32 %v1564_v8  ;;  %v1565_v11 = vmul.f32 -1.442695, %v1221_v9  ;;  %v1327_v14 = vsel %vm1226_vm1, %v2009_v10, %v2496_v54 }
 0x3c6   : > { %v2013_v12 = vpop.eup %2012  ;;  %v1331_v50 = vsel %vm1226_vm1, %v2011_v36, %v2499_v57 }
 0x3c7   : > { %v2015_v13 = vpop.eup %2014  ;;  %v1328_v56 = vsel %vm1226_vm1, %v2013_v12, %v2504_v63  ;;  %2026 = vpow2.f32 %v1565_v11 }
 0x3c8   : > { %v2017_v55 = vpop.eup %2016  ;;  %v1617_v18 = vpack.c.bf16 %v1328_v56, %v1327_v14  ;;  %v1332_v20 = vsel %vm1226_vm1, %v2015_v13, %v2507_v39 }
 0x3c9   : > { %v2019_v21 = vpop.eup %2018  ;;  %v1627_v23 = vpack.c.bf16 %v1332_v20, %v1331_v50  ;;  %v1287_v24 = vadd.f32 1.0, %v2017_v55 }
 0x3ca   : > { %1645 = vst [vmem:[%s2534_s25 + $0x10] sm:$0xff] %v1617_v18   ;;  %v1288_v54 = vadd.f32 1.0, %v2019_v21 }
 0x3cb   : > { %1647 = vst [vmem:[%s2534_s25 + $0x20] sm:$0xff] %v1627_v23   ;;  %2028 = vrcp.f32 %v1287_v24 }
 0x3cc   : > { %v2021_v63 = vpop.eup %2020  ;;  %2030 = vrcp.f32 %v1288_v54 }
 0x3cd   : > { %v1333_v57 = vsel %vm1226_vm1, %v2021_v63, %v2515_v16 }
 0x3ce   : > { %v2023_v25 = vpop.eup %2022 }
 0x3cf   : > { %v2025_v26 = vpop.eup %2024  ;;  %v1334_v39 = vsel %vm1226_vm1, %v2023_v25, %v2519_v19 }
 0x3d0   : > { %v1632_v27 = vpack.c.bf16 %v1334_v39, %v1333_v57  ;;  %v1289_v29 = vadd.f32 1.0, %v2025_v26 }
 0x3d1   : > { %v2027_v30 = vpop.eup %2026 }
 0x3d2   : > { %1648 = vst [vmem:[%s2534_s25 + $0x28] sm:$0xff] %v1632_v27   ;;  %2032 = vrcp.f32 %v1289_v29  ;;  %v1290_v32 = vadd.f32 1.0, %v2027_v30 }
 0x3d4   : > { %2034 = vrcp.f32 %v1290_v32 }
 0x3d5   : > { %v2029_v33 = vpop.eup %2028 }
 0x3d6   : > { %v2031_v35 = vpop.eup %2030  ;;  %v1335_v16 = vsel %vm1226_vm1, %v2029_v33, %v2532_v22 }
 0x3d7   : > { %v1336_v19 = vsel %vm1226_vm1, %v2031_v35, %v2539_v47 }
 0x3d8   : > { %v1637_v37 = vpack.c.bf16 %v1336_v19, %v1335_v16 }
 0x3da   : > { %1649 = vst [vmem:[%s2534_s25 + $0x30] sm:$0xff] %v1637_v37  }
 0x3dc   : > { %v2033_v38 = vpop.eup %2032 }
 0x3dd   : > { %v1337_v42 = vsel %vm1226_vm1, %v2033_v38, %v1218_v6 }
 0x3de   : > { %v2035_v41 = vpop.eup %2034 }
 0x3df   : > { %v1338_v43 = vsel %vm1226_vm1, %v2035_v41, %v1221_v9 }
 0x3e0   : > { %v1642_v22 = vpack.c.bf16 %v1338_v43, %v1337_v42 }
 0x3e2   : > { %1650 = vst [vmem:[%s2534_s25 + $0x38] sm:$0xff] %v1642_v22  }
 0x3e3   : > { %2049 = shalt.err (!%p2046_p3)
}
 0x3e4   : > { %s2050_s22 = scalar_lea.hbm %s2595_s29, 1024  ;;  %s2054_s26 = scalar_lea.hbm %s2652_s9, 2048 }
 0x3e5   : > { %p2051_p4 = scmp.ne.s32.totalorder %s2595_s29, %s2050_s22  ;;  %p2055_p9 = scmp.lt.u32.totalorder %s2595_s29, %s2652_s9 }
 0x3e6   : > { %p2056_p10 = scmp.lt.u32.totalorder %s2054_s26, %s2050_s22  ;;  %p2058_p12 = scmp.lt.u32.totalorder %s2050_s22, %s2595_s29 }
 0x3e7   : > { %p2052_p7 = pnand %p2051_p4, %p2191_p5 }
 0x3e8   : > { %p2057_p11 = por %p2056_p10, %p2055_p9 }
 0x3e9   : > { %p2053_p8 = pneg %p2052_p7 }
 0x3ea   : > { %p2059_p13 = por %p2058_p12, %p2057_p11 }
 0x3ec   : > { %p2060_p0 = pnand %p2059_p13, %p2053_p8 }
 0x3ee   : > { %2063 = shalt.err (!%p2060_p0)
}
 0x3ef   : > { %s2101_s14 = smov 64   ;;  %s2102_s16 = smov 4  }
 0x3f0   : > { %1863 = dma.vmem_to_hbm [thread:$0]  (%p2191_p5), %s2597_s24, 1024, %s2595_s29, %s2602_s13, %s2101_s14, %s2101_s14, %s2102_s16  }
 0x3f1 PF: > { %p1869_p1 = scmp.ge.s32.totalorder %s2098_s12, 2  ;;  %s1448_s17 = sand.u32 1, %s2086_s30  }
 0x3f2   : > { %s1449_s21 = scalar_lea.sflag [#allocation3], %s1448_s17 }
 0x3f3   : > { %p1866_p2 = pnand %p1869_p1, %p2195_p6 }
 0x3f5   : > { %2081 = dma.done.wait (!%p1866_p2), %s1449_s21, 1024  }
 0x3f6   : > { %2083 = vsyncadd (!%p1866_p2), %s1449_s21, 4294966272  ;;  %p19_p3 = scmp.ge.s32.totalorder %s2178_s15, 4   ;;  %s2655_s30 = smov %s2090_s10 }
 0x3f7   : > { %s2656_s10 = smov %s2094_s11  ;;  %s2657_s11 = smov %s2189_s18 }
 0x3f8   : > { %s2658_s12 = smov %s2178_s15  ;;  %21 = sbr.rel (!%p19_p3) target bundleno = 3 (0x3), region = 91 }
 0x3ff   :  { %1454 = vsyncpa [#allocation3], 1 }
 0x400   :  { %1456 = vsyncpa [#allocation3 + $0x1], 1 }

</bundles_post_ra>
